<compile_context>
chip_gen: v5e
topology: v5e:2x2
jax: 0.10.0
libtpu: 0.0.40
codegen_flags: <defaults>
</compile_context>

<pallas_src>
import jax
import jax.numpy as jnp
from jax.experimental import pallas as pl
from jax.experimental.pallas import tpu as pltpu

LANE = 128


def fc_kernel(x_ref, w_ref, b_ref, o_ref, acc_ref):
    """One (batch-tile, HW-tile) grid step.

    x_ref  : (tn, C, thw)   activation chunk (native dtype)
    w_ref  : (C, OUT_pad)   weight.T pre-scaled by 1/(H*W), zero-padded lanes
    b_ref  : (1, OUT_pad)   bias, zero-padded lanes
    o_ref  : (tn, OUT_pad)  output tile (resident across the HW axis)
    acc_ref: (tn, C) f32    VMEM partial-sum accumulator
    """
    hw_id = pl.program_id(1)

    @pl.when(hw_id == 0)
    def _():
        acc_ref[...] = jnp.zeros_like(acc_ref)

    # Pure add-reduction over this H*W chunk; cast per-chunk, accumulate in f32.
    acc_ref[...] += jnp.sum(x_ref[...].astype(jnp.float32), axis=-1)

    @pl.when(hw_id == pl.num_programs(1) - 1)
    def _():
        # Pooling scale is already folded into w_ref; bias + ReLU applied once.
        y = jnp.dot(acc_ref[...], w_ref[...], preferred_element_type=jnp.float32)
        y = y + b_ref[...]
        o_ref[...] = jnp.maximum(y, 0.0).astype(o_ref.dtype)


def _pick_batch_tile(n):
    if n <= 8:
        return n
    for t in (64, 32, 16, 8):
        if n % t == 0:
            return t
    return 8  # tail block handled by pl.cdiv padding (pad rows are sliced off)


def _pick_hw_tile(hw, tn, c, itemsize, max_tile_lanes, vmem_tile_bytes=6 << 20):
    """Largest multiple of 128 that divides HW and fits the per-buffer budget."""
    if hw % LANE != 0:
        return hw  # full-extent trailing dim (always a legal block shape)
    byte_cap = max(LANE, vmem_tile_bytes // max(1, tn * c * itemsize))
    cap = min(hw, max_tile_lanes, byte_cap)
    best = LANE
    t = LANE
    while t <= cap:
        if hw % t == 0:  # must divide exactly: HW is a reduction axis
            best = t
        t += LANE
    return best


def fc_forward(x_nchw, weight, bias, *, max_tile_lanes=4096):
    """ReLU(Linear(globalAvgPool(x))).reshape(N, OUT, 1, 1).

    x_nchw: (N, C, H, W); weight: (OUT, C) (PyTorch layout); bias: (OUT,)
    """
    N, C, H, W = x_nchw.shape
    OUT = weight.shape[0]
    HW = H * W

    # Stream x as (N, C, H*W): lane axis = H*W (the reduction axis).
    x3 = x_nchw.reshape(N, C, HW)

    # Fold 1/(H*W) into the weight; pad OUT up to a full 128-lane tile so the
    # output store is lane-dense. Done once per call on tiny (C, OUT) tensors.
    out_pad = max(LANE, ((OUT + LANE - 1) // LANE) * LANE)
    w_prep = (weight.astype(jnp.float32) / jnp.float32(HW)).T          # (C, OUT)
    w_prep = jnp.pad(w_prep, ((0, 0), (0, out_pad - OUT)))             # (C, OUT_pad)
    b_prep = jnp.pad(bias.astype(jnp.float32), (0, out_pad - OUT)).reshape(1, out_pad)

    tn = _pick_batch_tile(N)
    thw = _pick_hw_tile(HW, tn, C, x3.dtype.itemsize, max_tile_lanes)
    grid = (pl.cdiv(N, tn), HW // thw)

    out = pl.pallas_call(
        fc_kernel,
        out_shape=jax.ShapeDtypeStruct((N, out_pad), jnp.float32),
        grid=grid,
        in_specs=[
            pl.BlockSpec((tn, C, thw), lambda i, j: (i, 0, j)),
            pl.BlockSpec((C, out_pad), lambda i, j: (0, 0)),
            pl.BlockSpec((1, out_pad), lambda i, j: (0, 0)),
        ],
        out_specs=pl.BlockSpec((tn, out_pad), lambda i, j: (i, 0)),
        scratch_shapes=[pltpu.VMEM((tn, C), jnp.float32)],
        compiler_params=pltpu.CompilerParams(
            # batch tiles shard across TensorCores (v7x megacore); the HW axis
            # is the reduction carried in the VMEM accumulator.
            dimension_semantics=("parallel", "arbitrary"),
        ),
    )(x3, w_prep, b_prep)

    # x.view([-1, out_channel, 1, 1]) ; drop the lane padding.
    return out[:, :OUT].reshape(N, OUT, 1, 1)


def reference_forward(x_nchw, weight, bias):
    pooled = jnp.mean(x_nchw.astype(jnp.float32), axis=(2, 3))         # (N, C)
    y = pooled @ weight.astype(jnp.float32).T + bias.astype(jnp.float32)
    y = jnp.maximum(y, 0.0)
    return y.reshape(x_nchw.shape[0], weight.shape[0], 1, 1)


if __name__ == "__main__":
    key = jax.random.PRNGKey(0)
    k_x, k_w, k_b = jax.random.split(key, 3)

    N, C, H, W = 2, 4, 16, 16
    OUT = 8

    x = jax.random.normal(k_x, (N, C, H, W), dtype=jnp.float32)
    # deterministic PyTorch-like Linear init: U(-1/sqrt(C), 1/sqrt(C))
    bound = 1.0 / jnp.sqrt(jnp.float32(C))
    weight = jax.random.uniform(k_w, (OUT, C), jnp.float32, -bound, bound)
    bias = jax.random.uniform(k_b, (OUT,), jnp.float32, -bound, bound)

    ref = reference_forward(x, weight, bias)

    # 1) default tiling (whole H*W in one lane tile at this small shape)
    out = jax.block_until_ready(fc_forward(x, weight, bias))
    assert out.shape == (N, OUT, 1, 1)
    assert jnp.allclose(out, ref, atol=1e-5, rtol=1e-5)

    # 2) force 128-lane H*W tiles to exercise the multi-step f32 accumulator
    #    + @pl.when epilogue path (the path real activation sizes take).
    out2 = jax.block_until_ready(fc_forward(x, weight, bias, max_tile_lanes=128))
    assert jnp.allclose(out2, ref, atol=1e-5, rtol=1e-5)

    print("KERNEL_OK")
</pallas_src>

<mosaic_0001>
module attributes {stable_mosaic.version = 11 : i64} {
  func.func @fc_kernel(%arg0: i32, %arg1: i32, %arg2: memref<2x4x256xf32, #tpu.memory_space<vmem>>, %arg3: memref<4x128xf32, #tpu.memory_space<vmem>>, %arg4: memref<1x128xf32, #tpu.memory_space<vmem>>, %arg5: memref<2x128xf32, #tpu.memory_space<vmem>>, %arg6: memref<2x4xf32, #tpu.memory_space<vmem>>) attributes {dimension_semantics = [#tpu.dimension_semantics<parallel>, #tpu.dimension_semantics<arbitrary>], iteration_bounds = array<i64: 1, 1>, scalar_prefetch = 0 : i64, scratch_operands = 1 : i64, tpu.core_type = #tpu.core_type<tc>, window_params = [{transform_indices = @transform_0, window_bounds = array<i64: 2, 4, 256>}, {pipeline_mode = #tpu.pipeline_mode<synchronous>, transform_indices = @transform_1, window_bounds = array<i64: 4, 128>}, {pipeline_mode = #tpu.pipeline_mode<synchronous>, transform_indices = @transform_2, window_bounds = array<i64: 1, 128>}, {transform_indices = @transform_3, window_bounds = array<i64: 2, 128>}]} {
    %c0_i32 = arith.constant 0 : i32
    %0 = arith.cmpi eq, %arg1, %c0_i32 : i32
    %1 = arith.extui %0 : i1 to i32
    %c0_i32_0 = arith.constant 0 : i32
    %2 = arith.cmpi ne, %1, %c0_i32_0 : i32
    scf.if %2 {
      %cst_9 = arith.constant 0.000000e+00 : f32
      %11 = vector.broadcast %cst_9 : f32 to vector<2x4xf32>
      %c0_10 = arith.constant 0 : index
      %c0_11 = arith.constant 0 : index
      %12 = vector.load %arg6[%c0_10, %c0_11] : memref<2x4xf32, #tpu.memory_space<vmem>>, vector<2x4xf32>
      tpu.vector_store %arg6[%c0_10, %c0_11], %11 {strides = array<i32>} : memref<2x4xf32, #tpu.memory_space<vmem>>, vector<2x4xf32>,
    } else {
    }
    %c0 = arith.constant 0 : index
    %c0_1 = arith.constant 0 : index
    %3 = vector.load %arg6[%c0, %c0_1] : memref<2x4xf32, #tpu.memory_space<vmem>>, vector<2x4xf32>
    %c0_2 = arith.constant 0 : index
    %c0_3 = arith.constant 0 : index
    %c0_4 = arith.constant 0 : index
    %4 = vector.load %arg2[%c0_2, %c0_3, %c0_4] : memref<2x4x256xf32, #tpu.memory_space<vmem>>, vector<2x4x256xf32>
    %cst = arith.constant dense<0.000000e+00> : vector<2x4xf32>
    %5 = vector.multi_reduction <add>, %4, %cst [2] : vector<2x4x256xf32> to vector<2x4xf32>
    %6 = arith.addf %3, %5 : vector<2x4xf32>
    %c0_5 = arith.constant 0 : index
    %c0_6 = arith.constant 0 : index
    %7 = vector.load %arg6[%c0_5, %c0_6] : memref<2x4xf32, #tpu.memory_space<vmem>>, vector<2x4xf32>
    tpu.vector_store %arg6[%c0_5, %c0_6], %6 {strides = array<i32>} : memref<2x4xf32, #tpu.memory_space<vmem>>, vector<2x4xf32>,
    %c0_i32_7 = arith.constant 0 : i32
    %8 = arith.cmpi eq, %arg1, %c0_i32_7 : i32
    %9 = arith.extui %8 : i1 to i32
    %c0_i32_8 = arith.constant 0 : i32
    %10 = arith.cmpi ne, %9, %c0_i32_8 : i32
    scf.if %10 {
      %c0_9 = arith.constant 0 : index
      %c0_10 = arith.constant 0 : index
      %11 = vector.load %arg6[%c0_9, %c0_10] : memref<2x4xf32, #tpu.memory_space<vmem>>, vector<2x4xf32>
      %c0_11 = arith.constant 0 : index
      %c0_12 = arith.constant 0 : index
      %12 = vector.load %arg3[%c0_11, %c0_12] : memref<4x128xf32, #tpu.memory_space<vmem>>, vector<4x128xf32>
      %cst_13 = arith.constant dense<0.000000e+00> : vector<2x128xf32>
      %13 = tpu.matmul %11, %12, %cst_13 {dimension_numbers = #tpu.dot_dimension_numbers<[1], [0], [0], [1], [0, 0, 1, 1], [], []>} : vector<2x4xf32>, vector<4x128xf32>, vector<2x128xf32> -> vector<2x128xf32>
      %c0_14 = arith.constant 0 : index
      %c0_15 = arith.constant 0 : index
      %14 = vector.load %arg4[%c0_14, %c0_15] : memref<1x128xf32, #tpu.memory_space<vmem>>, vector<1x128xf32>
      %15 = vector.broadcast %14 : vector<1x128xf32> to vector<2x128xf32>
      %16 = arith.addf %13, %15 : vector<2x128xf32>
      %cst_16 = arith.constant 0.000000e+00 : f32
      %17 = vector.broadcast %cst_16 : f32 to vector<2x128xf32>
      %18 = arith.maximumf %16, %17 : vector<2x128xf32>
      %c0_17 = arith.constant 0 : index
      %c0_18 = arith.constant 0 : index
      %19 = vector.load %arg5[%c0_17, %c0_18] : memref<2x128xf32, #tpu.memory_space<vmem>>, vector<2x128xf32>
      tpu.vector_store %arg5[%c0_17, %c0_18], %18 {strides = array<i32>} : memref<2x128xf32, #tpu.memory_space<vmem>>, vector<2x128xf32>,
    } else {
    }
    return
  }
  func.func @transform_0(%arg0: i32, %arg1: i32) -> (i32, i32, i32) {
    %c0_i32 = arith.constant 0 : i32
    %c0_i32_0 = arith.constant 0 : i32
    return %arg0, %c0_i32, %arg1 : i32, i32, i32
  }
  func.func @transform_1(%arg0: i32, %arg1: i32) -> (i32, i32) {
    %c0_i32 = arith.constant 0 : i32
    %c0_i32_0 = arith.constant 0 : i32
    %c0_i32_1 = arith.constant 0 : i32
    return %c0_i32, %c0_i32_0 : i32, i32
  }
  func.func @transform_2(%arg0: i32, %arg1: i32) -> (i32, i32) {
    %c0_i32 = arith.constant 0 : i32
    %c0_i32_0 = arith.constant 0 : i32
    %c0_i32_1 = arith.constant 0 : i32
    return %c0_i32, %c0_i32_0 : i32, i32
  }
  func.func @transform_3(%arg0: i32, %arg1: i32) -> (i32, i32) {
    %c0_i32 = arith.constant 0 : i32
    %c0_i32_0 = arith.constant 0 : i32
    return %arg0, %c0_i32 : i32, i32
  }
}

</mosaic_0001>

<bundles_post_ra>
// kernel: tpu_custom_call.1
= control target key start
LH: loop header
LB: loop body
LE: loop exit
PB: predicated region body
PF: predicated region fallthrough
CT: control target
= control target key end

     0   :  { %8 = vsyncpa [#allocation4], 0  ;;  %s276_s0 = inlined_call_operand.hbm [shape: f32[2,4,256], index: 0, kind: input, shape index: {}]   ;;  %s277_s1 = inlined_call_operand.hbm [shape: f32[4,128], index: 1, kind: input, shape index: {}]   ;;  %s278_s2 = inlined_call_operand.vmem [shape: f32[1,128], index: 2, kind: input, shape index: {}]   ;;  %s279_s3 = inlined_call_operand.hbm [shape: f32[2,128], index: 3, kind: output, shape index: {}]  }
   0x1   :  { %9 = vsyncpa [#allocation7], 0 }
   0x2   :  { %10 = vsyncpa [#allocation5], 0  ;;  %s15_s14 = sshll.u32 %s276_s0, 4  ;;  %s233_s15 = smov [#allocation3]   ;;  %s16_s14 = int_to_ptr.hbm [resolvable:$true] %s15_s14 }
   0x3   :  { %s17_s16 = sshll.u32 %s233_s15, 4  ;;  %s29_s19 = sshll.u32 %s277_s1, 4  ;;  %s18_s16 = int_to_ptr.vmem [resolvable:$true] %s17_s16  ;;  %s30_s19 = int_to_ptr.hbm [resolvable:$true] %s29_s19 }
   0x4   :  { %s234_s20 = smov 128   ;;  %s235_s21 = smov 8  }
   0x5   :  { %23 = dma.hbm_to_vmem [thread:$0]  %s16_s14, 256, %s18_s16, [#allocation4], %s234_s20, %s234_s20, %s235_s21  }
   0x6   :  { %s236_s22 = smov [#allocation6]  }
   0x7   :  { %s31_s23 = sshll.u32 %s236_s22, 4  ;;  %s32_s23 = int_to_ptr.vmem [resolvable:$true] %s31_s23 }
   0x8   :  { %34 = dma.hbm_to_vmem [thread:$0]  %s30_s19, 64, %s32_s23, [#allocation7]  }
   0x9   :  { %227 = dma.done.wait [#allocation4], 256  }
   0xa   :  { %228 = vsyncadd [#allocation4], 4294967040 }
   0xb   :  { %229 = dma.done.wait [#allocation7], 64  }
   0xc   :  { %230 = vsyncadd [#allocation7], 4294967232  ;;  %v52_v0 = vld [vmem:[#allocation3] sm:$0xff]  ;;  %v53_v1 = vld [vmem:[#allocation3 + $0x8] sm:$0xff]  ;;  %vm67_vm0 = vcmask 1043456   ;;  %vm49_vm1 = vcmask 25600   ;;  %v80_v15 = vlaneseq }
   0xd   :  { %56 = vst [vmem:[#allocation1] ss:$2 sm:$0xff] %v52_v0  ;;  %v237_v12 = vmov 0.0   ;;  %v94_v13 = vld [vmem:[#allocation6] sm:$0xf]  ;;  %vm84_vm2 = vcmask 1041409  }
   0xe   :  { %60 = vst [vmem:[#allocation1 + $0x10] ss:$2 sm:$0xff] %v53_v1  ;;  %146 = vmatpush.msk.msra.mxu0 %vm67_vm0, %v94_v13  ;;  %v81_v16 = vand.u32 127, %v80_v15  ;;  %vm99_vm3 = vcmask 31744   ;;  %v154_v24 = vld [vmem:[%s278_s2] ss:$0 sm:$0xff] }
   0xf   :  { %50 = vst.msk [vmem:[#allocation2] sm:$0x3] %vm49_vm1, %v237_v12  ;;  %s238_s24 = smov [#allocation8]   ;;  %s135_s28 = sshll.u32 %s279_s3, 4  ;;  %s136_s28 = int_to_ptr.hbm [resolvable:$true] %s135_s28 }
  0x10   :  { %s133_s25 = sshll.u32 %s238_s24, 4  ;;  %s134_s25 = int_to_ptr.vmem [resolvable:$true] %s133_s25 }
  0x14   :  { %v57_v2 = vld.sshfl [vmem:[#allocation1] sm:$0xff pattern:$0x75316420]  ;;  %v58_v3 = vld.sshfl [vmem:[#allocation1 + $0x8] sm:$0xff pattern:$0x75316420] }
  0x15   :  { %v68_v4 = vsel %vm67_vm0, %v57_v2, 0.0  ;;  %v69_v5 = vsel %vm67_vm0, %v58_v3, 0.0  ;;  %v61_v7 = vld.sshfl [vmem:[#allocation1 + $0x10] sm:$0xff pattern:$0x75316420] }
  0x16   :  { %v70_v6 = vadd.f32 %v69_v5, %v68_v4  ;;  %v62_v8 = vld.sshfl [vmem:[#allocation1 + $0x18] sm:$0xff pattern:$0x75316420]  ;;  %v73_v9 = vsel %vm67_vm0, %v61_v7, 0.0  ;;  %v51_v19 = vld [vmem:[#allocation2] sm:$0x3] }
  0x17   :  { %v74_v10 = vsel %vm67_vm0, %v62_v8, 0.0 }
  0x18   :  { %71 = vadd.xlane.f32.xlu0 %v70_v6  ;;  %v75_v11 = vadd.f32 %v74_v10, %v73_v9 }
  0x20   :  { %76 = vadd.xlane.f32.xlu0 %v75_v11 }
  0x8b   :  { %v72_v14 = vpop.xlane.xlu0 %71 }
  0x8c   :  { %v82_v18 = vperm.slane %v72_v14, %v81_v16 }
  0x93   :  { %v77_v17 = vpop.xlane.xlu0 %76 }
  0x94   :  { %v83_v20 = vperm.slane %v77_v17, %v81_v16 }
  0x96   :  { %v85_v21 = vsel %vm84_vm2, %v83_v20, %v82_v18 }
  0x97   :  { %v87_v22 = vadd.f32 %v85_v21, %v51_v19 }
  0x99   :  { %89 = vst.msk [vmem:[#allocation2] sm:$0x3] %vm49_vm1, %v87_v22 }
  0xa0   :  { %v93_v23 = vld [vmem:[#allocation2] sm:$0x3] }
  0xa1   :  { %147 = vmatmul.msk.f32.vlgmr.msra.gmra.mxu0 %vm99_vm3, %v93_v23 }
 0x11e   :  { %v123_v25 = vpop.f32.mrf.mxu0 }
 0x11f   :  { %v124_v26 = vadd.f32 %v154_v24, %v123_v25 }
 0x121   :  { %v126_v27 = vmax.f32 %v124_v26, 0.0 }
 0x123   :  { %127 = vst [vmem:[#allocation8] sm:$0x3] %v126_v27 }
 0x124   :  { %138 = dma.vmem_to_hbm [thread:$0]  %s134_s25, 32, %s136_s28, [#allocation5]  }
 0x125   :  { %231 = dma.done.wait [#allocation5], 32  }
 0x126   :  { %232 = vsyncadd [#allocation5], 4294967264 }
 0x127   :  { %143 = vsyncpa [#allocation4], 1 }
 0x128   :  { %144 = vsyncpa [#allocation7], 1 }
 0x129   :  { %145 = vsyncpa [#allocation5], 1 }

</bundles_post_ra>
